<compile_context>
chip_gen: v7x
topology: tpu7x:2x2x1
jax: 0.10.0
libtpu: 0.0.40
codegen_flags: <defaults>
</compile_context>

<pallas_src>
import jax
import jax.numpy as jnp
import numpy as np
from jax.experimental import pallas as pl
from jax.experimental.pallas import tpu as pltpu


def _crelu_kernel(x_ref, w_ref, b_ref, o_ref):
    """Fused cat((x, -x)) * per-channel scale + bias -> ReLU.

    x_ref: (1, C, THW)     input tile (one batch element, all channels, spatial tile)
    w_ref: (2, C, 1)       Scale weight; [0] -> +x half, [1] -> -x half
    b_ref: (2, C, 1)       Scale bias
    o_ref: (1, 2, C, THW)  output tile; axis 1 = (+x half, -x half)
    """
    x = x_ref[0]                                            # (C, THW), lane-dense
    # +x half: relu(x * w0 + b0)
    o_ref[0, 0] = jnp.maximum(x * w_ref[0] + b_ref[0], 0.0)
    # -x half: relu(-x * w1 + b1) == relu(x * (-w1) + b1); negate the tiny (C,1)
    # weight instead of the full (C, THW) tile.
    o_ref[0, 1] = jnp.maximum(x * (-w_ref[1]) + b_ref[1], 0.0)


def _pick_spatial_tile(hw, max_tile=2048):
    """Largest lane-aligned (multiple of 128) divisor of hw, capped at max_tile.
    Falls back to the full extent, which is always a legal BlockSpec dim."""
    if hw <= max_tile:
        return hw
    best = None
    t = 128
    while t <= max_tile:
        if hw % t == 0:
            best = t
        t += 128
    return best if best is not None else hw


def crelu(x_nchw, weight, bias):
    """PyTorch-equivalent CReLU forward.

    x_nchw: (N, C, H, W); weight, bias: (1, 2C, 1, 1) Scale parameters.
    Returns (N, 2C, H, W).
    """
    N, C, H, W = x_nchw.shape
    HW = H * W
    assert weight.shape == (1, 2 * C, 1, 1), weight.shape
    assert bias.shape == (1, 2 * C, 1, 1), bias.shape

    # Pure views (no transpose, no data movement).
    x3 = x_nchw.reshape(N, C, HW)
    w2 = weight.reshape(2, C, 1).astype(x3.dtype)
    b2 = bias.reshape(2, C, 1).astype(x3.dtype)

    thw = _pick_spatial_tile(HW)
    grid = (N, HW // thw)

    out = pl.pallas_call(
        _crelu_kernel,
        out_shape=jax.ShapeDtypeStruct((N, 2, C, HW), x3.dtype),
        grid_spec=pltpu.PrefetchScalarGridSpec(
            num_scalar_prefetch=0,
            grid=grid,
            in_specs=[
                pl.BlockSpec((1, C, thw), lambda n, s: (n, 0, s)),
                pl.BlockSpec((2, C, 1), lambda n, s: (0, 0, 0)),
                pl.BlockSpec((2, C, 1), lambda n, s: (0, 0, 0)),
            ],
            out_specs=pl.BlockSpec((1, 2, C, thw), lambda n, s: (n, 0, 0, s)),
        ),
        compiler_params=pltpu.CompilerParams(
            dimension_semantics=("parallel", "parallel")),
    )(x3, w2, b2)

    # (N, 2, C, HW) -> (N, 2C, H, W): channels [0:C] are the +x half, [C:2C]
    # the -x half, exactly matching torch.cat((x, -x), dim=1). Pure view.
    return out.reshape(N, 2 * C, H, W)


def _reference(x, weight, bias):
    """Pure-JAX reference mirroring the PyTorch module."""
    x1 = jnp.concatenate([x, -x], axis=1)
    return jnp.maximum(x1 * weight + bias, 0.0)


if __name__ == "__main__":
    nchannels = 4
    N, H, W = 2, 16, 16

    key = jax.random.PRNGKey(0)
    kx, kw, kb = jax.random.split(key, 3)

    x = jax.random.normal(kx, (N, nchannels, H, W), jnp.float32)

    # Scale parameters. Module defaults are weight=1, bias=0; use non-trivial
    # deterministic values so the per-channel broadcast path is exercised.
    weight = jax.random.normal(kw, (1, 2 * nchannels, 1, 1), jnp.float32)
    bias = 0.1 * jax.random.normal(kb, (1, 2 * nchannels, 1, 1), jnp.float32)

    out = jax.block_until_ready(crelu(x, weight, bias))
    ref = jax.block_until_ready(_reference(x, weight, bias))

    assert out.shape == (N, 2 * nchannels, H, W), out.shape
    np.testing.assert_allclose(np.asarray(out), np.asarray(ref),
                               rtol=1e-6, atol=1e-6)
    print("KERNEL_OK")
</pallas_src>

<mosaic_0001>
module attributes {stable_mosaic.version = 11 : i64} {
  func.func @_crelu_kernel(%arg0: i32, %arg1: i32, %arg2: memref<1x4x256xf32, #tpu.memory_space<vmem>>, %arg3: memref<2x4x1xf32, #tpu.memory_space<vmem>>, %arg4: memref<2x4x1xf32, #tpu.memory_space<vmem>>, %arg5: memref<1x2x4x256xf32, #tpu.memory_space<vmem>>) attributes {dimension_semantics = [#tpu.dimension_semantics<parallel>, #tpu.dimension_semantics<parallel>], iteration_bounds = array<i64: 2, 1>, scalar_prefetch = 0 : i64, scratch_operands = 0 : i64, tpu.core_type = #tpu.core_type<tc>, window_params = [{transform_indices = @transform_0, window_bounds = array<i64: 1, 4, 256>}, {pipeline_mode = #tpu.pipeline_mode<synchronous>, transform_indices = @transform_1, window_bounds = array<i64: 2, 4, 1>}, {pipeline_mode = #tpu.pipeline_mode<synchronous>, transform_indices = @transform_2, window_bounds = array<i64: 2, 4, 1>}, {transform_indices = @transform_3, window_bounds = array<i64: 1, 2, 4, 256>}]} {
    %c0 = arith.constant 0 : index
    %c0_0 = arith.constant 0 : index
    %c0_1 = arith.constant 0 : index
    %0 = vector.load %arg2[%c0, %c0_0, %c0_1] : memref<1x4x256xf32, #tpu.memory_space<vmem>>, vector<1x4x256xf32>
    %1 = vector.shape_cast %0 : vector<1x4x256xf32> to vector<4x256xf32>
    %c0_2 = arith.constant 0 : index
    %c0_3 = arith.constant 0 : index
    %c0_4 = arith.constant 0 : index
    %2 = vector.load %arg3[%c0_2, %c0_3, %c0_4] : memref<2x4x1xf32, #tpu.memory_space<vmem>>, vector<1x4x1xf32>
    %3 = vector.shape_cast %2 : vector<1x4x1xf32> to vector<4x1xf32>
    %4 = vector.broadcast %3 : vector<4x1xf32> to vector<4x256xf32>
    %5 = arith.mulf %1, %4 : vector<4x256xf32>
    %c0_5 = arith.constant 0 : index
    %c0_6 = arith.constant 0 : index
    %c0_7 = arith.constant 0 : index
    %6 = vector.load %arg4[%c0_5, %c0_6, %c0_7] : memref<2x4x1xf32, #tpu.memory_space<vmem>>, vector<1x4x1xf32>
    %7 = vector.shape_cast %6 : vector<1x4x1xf32> to vector<4x1xf32>
    %8 = vector.broadcast %7 : vector<4x1xf32> to vector<4x256xf32>
    %9 = arith.addf %5, %8 : vector<4x256xf32>
    %cst = arith.constant 0.000000e+00 : f32
    %10 = vector.broadcast %cst : f32 to vector<4x256xf32>
    %11 = arith.maximumf %9, %10 : vector<4x256xf32>
    %c0_8 = arith.constant 0 : index
    %c0_9 = arith.constant 0 : index
    %c0_10 = arith.constant 0 : index
    %c0_11 = arith.constant 0 : index
    %12 = vector.load %arg5[%c0_8, %c0_9, %c0_10, %c0_11] : memref<1x2x4x256xf32, #tpu.memory_space<vmem>>, vector<1x1x4x256xf32>
    %13 = vector.shape_cast %12 : vector<1x1x4x256xf32> to vector<4x256xf32>
    %14 = vector.shape_cast %11 : vector<4x256xf32> to vector<1x1x4x256xf32>
    tpu.vector_store %arg5[%c0_8, %c0_9, %c0_10, %c0_11], %14 {strides = array<i32>} : memref<1x2x4x256xf32, #tpu.memory_space<vmem>>, vector<1x1x4x256xf32>,
    %c1 = arith.constant 1 : index
    %c0_12 = arith.constant 0 : index
    %c0_13 = arith.constant 0 : index
    %15 = vector.load %arg3[%c1, %c0_12, %c0_13] : memref<2x4x1xf32, #tpu.memory_space<vmem>>, vector<1x4x1xf32>
    %16 = vector.shape_cast %15 : vector<1x4x1xf32> to vector<4x1xf32>
    %cst_14 = arith.constant 0.000000e+00 : f32
    %17 = vector.broadcast %cst_14 : f32 to vector<4x1xf32>
    %18 = arith.subf %17, %16 : vector<4x1xf32>
    %19 = vector.broadcast %18 : vector<4x1xf32> to vector<4x256xf32>
    %20 = arith.mulf %1, %19 : vector<4x256xf32>
    %c1_15 = arith.constant 1 : index
    %c0_16 = arith.constant 0 : index
    %c0_17 = arith.constant 0 : index
    %21 = vector.load %arg4[%c1_15, %c0_16, %c0_17] : memref<2x4x1xf32, #tpu.memory_space<vmem>>, vector<1x4x1xf32>
    %22 = vector.shape_cast %21 : vector<1x4x1xf32> to vector<4x1xf32>
    %23 = vector.broadcast %22 : vector<4x1xf32> to vector<4x256xf32>
    %24 = arith.addf %20, %23 : vector<4x256xf32>
    %cst_18 = arith.constant 0.000000e+00 : f32
    %25 = vector.broadcast %cst_18 : f32 to vector<4x256xf32>
    %26 = arith.maximumf %24, %25 : vector<4x256xf32>
    %c0_19 = arith.constant 0 : index
    %c1_20 = arith.constant 1 : index
    %c0_21 = arith.constant 0 : index
    %c0_22 = arith.constant 0 : index
    %27 = vector.load %arg5[%c0_19, %c1_20, %c0_21, %c0_22] : memref<1x2x4x256xf32, #tpu.memory_space<vmem>>, vector<1x1x4x256xf32>
    %28 = vector.shape_cast %27 : vector<1x1x4x256xf32> to vector<4x256xf32>
    %29 = vector.shape_cast %26 : vector<4x256xf32> to vector<1x1x4x256xf32>
    tpu.vector_store %arg5[%c0_19, %c1_20, %c0_21, %c0_22], %29 {strides = array<i32>} : memref<1x2x4x256xf32, #tpu.memory_space<vmem>>, vector<1x1x4x256xf32>,
    return
  }
  func.func @transform_0(%arg0: i32, %arg1: i32) -> (i32, i32, i32) {
    %c0_i32 = arith.constant 0 : i32
    %c0_i32_0 = arith.constant 0 : i32
    return %arg0, %c0_i32, %arg1 : i32, i32, i32
  }
  func.func @transform_1(%arg0: i32, %arg1: i32) -> (i32, i32, i32) {
    %c0_i32 = arith.constant 0 : i32
    %c0_i32_0 = arith.constant 0 : i32
    %c0_i32_1 = arith.constant 0 : i32
    %c0_i32_2 = arith.constant 0 : i32
    return %c0_i32, %c0_i32_0, %c0_i32_1 : i32, i32, i32
  }
  func.func @transform_2(%arg0: i32, %arg1: i32) -> (i32, i32, i32) {
    %c0_i32 = arith.constant 0 : i32
    %c0_i32_0 = arith.constant 0 : i32
    %c0_i32_1 = arith.constant 0 : i32
    %c0_i32_2 = arith.constant 0 : i32
    return %c0_i32, %c0_i32_0, %c0_i32_1 : i32, i32, i32
  }
  func.func @transform_3(%arg0: i32, %arg1: i32) -> (i32, i32, i32, i32) {
    %c0_i32 = arith.constant 0 : i32
    %c0_i32_0 = arith.constant 0 : i32
    %c0_i32_1 = arith.constant 0 : i32
    return %arg0, %c0_i32, %c0_i32_0, %arg1 : i32, i32, i32, i32
  }
}

</mosaic_0001>

<bundles_post_ra>
// kernel: tpu_custom_call.1
= control target key start
LH: loop header
LB: loop body
LE: loop exit
PB: predicated region body
PF: predicated region fallthrough
CT: control target
= control target key end

     0   :  { %8 = vsyncpa [#allocation3], 0  ;;  %s671_s0 = inlined_call_operand.vmem [shape: f32[2,4,256], index: 0, kind: input, shape index: {}]   ;;  %s672_s1 = inlined_call_operand.vmem [shape: f32[2,4,1], index: 1, kind: input, shape index: {}]   ;;  %s673_s2 = inlined_call_operand.vmem [shape: f32[2,4,1], index: 2, kind: input, shape index: {}]   ;;  %s674_s3 = inlined_call_operand.hbm [shape: f32[2,2,4,256], index: 3, kind: output, shape index: {}]  }
   0x1   :  { %10 = vsyncpa [#allocation3 + $0x1], 0  ;;  %s544_s12 = smov 0   ;;  %s546_s13 = smov 0  }
   0x2   :  { %s548_s14 = smov 0   ;;  %s550_s15 = smov 0  }
   0x3   :  { %s552_s16 = smov 0   ;;  %s554_s17 = smov 0  }
   0x4 LB: > { %s360_s18 = sadd.s32 4294967295, %s517_s17   ;;  %s361_s19 = sadd.s32 4294967294, %s517_s17   ;;  %s517_s17 = sphi %s554_s17, %s16_s17   ;;  %s513_s16 = sphi %s552_s16, %s681_s16   ;;  %s509_s15 = sphi %s550_s15, %s680_s15   ;;  %s505_s14 = sphi %s548_s14, %s679_s14   ;;  %s501_s13 = sphi %s546_s13, %s678_s13   ;;  %s497_s12 = sphi %s544_s12, %s677_s12  }
   0x5   : > { %s28_s20 = sadd.s32 1, %s513_s16  ;;  %s107_s21 = sadd.s32 1, %s505_s14 }
   0x6   : > { %p30_p0 = scmp.ge.s32.totalorder %s28_s20, 2  ;;  %p117_p1 = scmp.ne.s32.totalorder %s505_s14, %s501_s13 }
   0x7   : > { %p118_p2 = scmp.eq.s32.totalorder %s360_s18, 1  ;;  %p123_p3 = scmp.ne.s32.totalorder %s501_s13, %s497_s12 }
   0x8   : > { %s683_s20 = smov (%p30_p0, %s28_s20), 0  ;;  %p124_p5 = scmp.eq.s32.totalorder %s361_s19, 1 }
   0x9   : > { %p584_p4 = por %p118_p2, %p117_p1  ;;  %s102_s23 = ssub.s32 %s513_s16, %s683_s20 }
   0xa   : > { %p364_p6 = scmp.ge.s32.totalorder %s517_s17, 1  ;;  %p105_p7 = scmp.eq.s32.totalorder %s102_s23, 0 }
   0xb   : > { %p591_p8 = por %p124_p5, %p123_p3  ;;  %p161_p9 = scmp.lt.s32.totalorder %s517_s17, 3 }
   0xc   : > { %s597_s25 = scalar_select %p105_p7, %s505_s14, %s107_s21  }
   0xd   : > { %p162_p10 = pnand %p364_p6, %p161_p9 }
   0xe   : > { %v215_v0 = vld [vmem:[%s673_s2] sm:$0xf] (!%p162_p10)  ;;  %v519_v2 = vmov (!%p162_p10), 0   ;;  %v368_v3 = vld [vmem:[%s672_s1 + $0x4] sm:$0xf] (!%p162_p10)  ;;  %p190_p11 = scmp.lt.s32.totalorder (!%p162_p10), %s509_s15, 1  ;;  %v209_v8 = vlaneseq (!%p162_p10) }
   0xf   : > { %165 = sbr.rel (%p162_p10) target bundleno = 171 (0xab), region = 32  ;;  %v201_v1 = vld [vmem:[%s672_s1] sm:$0xf] (!%p162_p10)  ;;  %438 = vset.pattern.permute.xlu1 (!%p162_p10), %v519_v2  ;;  %437 = vset.pattern.permute.xlu0 (!%p162_p10), %v519_v2  ;;  %v233_v4 = vsub.f32 (!%p162_p10), 0.0, %v368_v3  ;;  %v369_v5 = vld [vmem:[%s673_s2 + $0x4] sm:$0xf] (!%p162_p10) }
  0x10   : > { %218 = vperm.xlu1 (!%p162_p10), %438, %v215_v0   ;;  %204 = vperm.xlu0 (!%p162_p10), %437, %v201_v1   ;;  %v520_v6 = vmov (!%p162_p10), 839922192   ;;  %v210_v10 = vshrl.u32 (!%p162_p10), %v209_v8, 7  ;;  %s186_s18 = sand.u32 (!%p162_p10), 1, %s501_s13   ;;  %s377_s26 = sshll.u32 (!%p162_p10), %s509_s15, 8 }
  0x11   : > { %v207_v7 = vunpack.c.l.s4 (!%p162_p10), %v520_v6  ;;  %s365_s19 = sshll.u32 (!%p162_p10), %s186_s18, 4  ;;  %s621_s29 = scalar_lea.hbm (!%p162_p10), %s674_s3, %s377_s26 }
  0x12   : > { %s188_s21 = scalar_lea.vmem (!%p162_p10), [#allocation2], %s365_s19  ;;  %s625_s30 = scalar_lea.sflag (!%p162_p10), [#allocation3], %s186_s18 }
  0x13   : > { %v208_v9 = vunpack.c.0.s8 (!%p162_p10), %v207_v7  ;;  %s281_s23 = sshll.u32 (!%p162_p10), %s188_s21, 4  ;;  %s623_s23 = int_to_ptr.vmem [resolvable:$true] %s281_s23 }
  0x14   : > { %251 = vperm.xlu1 (!%p162_p10), %438, %v369_v5   ;;  %236 = vperm.xlu0 (!%p162_p10), %437, %v233_v4   ;;  %s439_s4 = scalar_lea.vmem (!%p162_p10), %s623_s23, 256 }
  0x15   : > { %v211_v11 = vsub.s32 (!%p162_p10), %v208_v9, %v210_v10  ;;  %p440_p12 = scmp.ne.s32.totalorder (!%p162_p10), %s623_s23, %s439_s4 }
  0x16   : > { %s191_s7 = scalar_select %p190_p11, %s509_s15, 1 }
  0x17   : > { %p441_p13 = pnand %p440_p12, %p584_p4  ;;  %s521_s15 = smov [#allocation2]  }
  0x18   : > { %s376_s8 = sshll.u32 %s191_s7, 3  ;;  %s443_s5 = sshll.u32 %s521_s15, 4  ;;  %s444_s5 = int_to_ptr.vmem [resolvable:$false] %s443_s5 }
  0x19   : > { %s197_s11 = scalar_lea.vmem %s671_s0, %s376_s8  ;;  %p442_p0 = pneg %p441_p13 }
  0x1a   : > { %v200_v14 = vld [vmem:[%s197_s11] sm:$0xff]  ;;  %s445_s6 = scalar_lea.vmem %s444_s5, 512  ;;  %p446_p1 = scmp.lt.s32.totalorder %s623_s23, %s444_s5 }
  0x1b   : > { %p447_p2 = scmp.lt.s32.totalorder %s445_s6, %s439_s4 }
  0x1d   : > { %p448_p3 = por %p447_p2, %p446_p1 }
  0x1f   : > { %p449_p5 = pnand %p448_p3, %p442_p0 }
  0x8f   : > { %v219_v12 = vpop.permute.xlu1 %218  ;;  %v205_v13 = vpop.permute.xlu0 %204 }
  0x90   : > { %v226_v15 = vrot.slane %v219_v12, %v211_v11  ;;  %v212_v16 = vrot.slane %v205_v13, %v211_v11 }
  0x92   : > { %v214_v17 = vmul.f32 %v212_v16, %v200_v14 }
  0x93   : > { %v252_v18 = vpop.permute.xlu1 %251  ;;  %v237_v19 = vpop.permute.xlu0 %236 }
  0x94   : > { %v228_v20 = vadd.f32 %v226_v15, %v214_v17  ;;  %v244_v21 = vrot.slane %v237_v19, %v211_v11  ;;  %v259_v23 = vrot.slane %v252_v18, %v211_v11 }
  0x96   : > { %v229_v22 = vmax.f32 %v228_v20, 0.0  ;;  %v246_v24 = vmul.f32 %v244_v21, %v200_v14 }
  0x98   : > { %230 = vst [vmem:[%s188_s21] sm:$0xff] %v229_v22  ;;  %v261_v25 = vadd.f32 %v259_v23, %v246_v24 }
  0x9a   : > { %v262_v26 = vmax.f32 %v261_v25, 0.0 }
  0x9c   : > { %370 = vst [vmem:[%s188_s21 + $0x8] sm:$0xff] %v262_v26 }
  0x9d   : > { %452 = shalt.err (!%p449_p5)
}
  0x9e   : > { %s453_s7 = scalar_lea.hbm %s621_s29, 256  ;;  %s457_s10 = scalar_lea.hbm %s674_s3, 512 }
  0x9f   : > { %p454_p6 = scmp.ne.s32.totalorder %s621_s29, %s453_s7  ;;  %p458_p10 = scmp.lt.u32.totalorder %s621_s29, %s674_s3 }
  0xa0   : > { %p459_p11 = scmp.lt.u32.totalorder %s457_s10, %s453_s7  ;;  %p461_p13 = scmp.lt.u32.totalorder %s453_s7, %s621_s29 }
  0xa1   : > { %p455_p7 = pnand %p454_p6, %p584_p4 }
  0xa2   : > { %p460_p12 = por %p459_p11, %p458_p10 }
  0xa3   : > { %p456_p9 = pneg %p455_p7 }
  0xa4   : > { %p462_p0 = por %p461_p13, %p460_p12 }
  0xa6   : > { %p463_p1 = pnand %p462_p0, %p456_p9 }
  0xa8   : > { %466 = shalt.err (!%p463_p1)
}
  0xa9   : > { %s522_s19 = smov 128   ;;  %s523_s21 = smov 8  }
  0xaa   : > { %378 = dma.vmem_to_hbm [thread:$0]  (%p584_p4), %s623_s23, 256, %s621_s29, %s625_s30, %s522_s19, %s522_s19, %s523_s21  }
  0xab PF: > { %p384_p2 = scmp.ge.s32.totalorder %s517_s17, 2  ;;  %s296_s26 = sand.u32 1, %s497_s12  }
  0xac   : > { %s297_s27 = scalar_lea.sflag [#allocation3], %s296_s26 }
  0xad   : > { %p381_p3 = pnand %p384_p2, %p591_p8 }
  0xaf   : > { %492 = dma.done.wait (!%p381_p3), %s297_s27, 256  }
  0xb0   : > { %494 = vsyncadd (!%p381_p3), %s297_s27, 4294967040  ;;  %s16_s17 = sadd.s32 1, %s517_s17   ;;  %s677_s12 = smov %s501_s13 }
  0xb1   : > { %p13_p5 = scmp.ge.s32.totalorder %s16_s17, 4   ;;  %s678_s13 = smov %s505_s14 }
  0xb2   : > { %s679_s14 = smov %s597_s25  ;;  %s680_s15 = smov %s513_s16 }
  0xb3   : > { %s681_s16 = smov %s683_s20  ;;  %15 = sbr.rel (!%p13_p5) target bundleno = 4 (0x4), region = 70 }
  0xba   :  { %302 = vsyncpa [#allocation3], 1 }
  0xbb   :  { %304 = vsyncpa [#allocation3 + $0x1], 1 }

</bundles_post_ra>
